<compile_context>
chip_gen: v6e
topology: v6e:2x2x1
jax: 0.10.0
libtpu: 0.0.40
codegen_flags: <defaults>
</compile_context>

<pallas_src>
import functools

import jax
import jax.numpy as jnp
import numpy as np
from jax import lax
from jax.experimental import pallas as pl
from jax.experimental.pallas import tpu as pltpu

EPS = 1e-5
_DOT_DIMS = (((1,), (1,)), ((), ()))   # contract last dim of x with last dim of weight (O,K)


def _bn_relu(y, gb):
    """Fused training-mode BatchNorm1d (biased var) + gamma/beta + ReLU on an f32 (N, tn) tile."""
    mean = jnp.mean(y, axis=0, keepdims=True)                      # (1, tile_n)
    centered = y - mean                                            # reused for var + normalize
    var = jnp.mean(centered * centered, axis=0, keepdims=True)     # biased variance
    y_hat = centered * lax.rsqrt(var + EPS)                        # rsqrt -> EUP slot
    out = y_hat * gb[0:1, :] + gb[1:2, :]                          # gamma / beta
    return jnp.maximum(out, 0.0)
    # TODO(synk): for very large N, compute sum / sum-of-squares as ones(1,N) @ y on the MXU so
    # the cross-sublane reduction stops loading the VPU/XLU (only if visible in the profile).


def _dense_block_single_kernel(x_ref, w_ref, gb_ref, o_ref):
    # Fast path: whole K contraction in one step. x:(N,K), w:(tile_n,K), gb:(2,tile_n).
    y = lax.dot_general(x_ref[...], w_ref[...], _DOT_DIMS,
                        preferred_element_type=jnp.float32)
    o_ref[...] = _bn_relu(y, gb_ref[...]).astype(o_ref.dtype)


def _dense_block_reduce_kernel(x_ref, w_ref, gb_ref, o_ref, *, tile_k, x_resident):
    # K is a trailing "arbitrary" grid axis. o_ref (f32) is resident across it and doubles as
    # the accumulator -- no separate VMEM scratch.
    k = pl.program_id(1)

    @pl.when(k == 0)
    def _init():
        o_ref[...] = jnp.zeros_like(o_ref)

    if x_resident:
        start = pl.multiple_of(k * tile_k, tile_k)
        x_blk = x_ref[:, pl.ds(start, tile_k)]          # x read from HBM exactly once
    else:
        x_blk = x_ref[...]                              # streamed fallback (huge N*K)

    o_ref[...] += lax.dot_general(x_blk, w_ref[...], _DOT_DIMS,
                                  preferred_element_type=jnp.float32)

    @pl.when(k == pl.num_programs(1) - 1)
    def _epilogue():
        # NOTE: Linear bias intentionally omitted -- exactly cancelled by the mean subtraction.
        o_ref[...] = _bn_relu(o_ref[...], gb_ref[...]).astype(o_ref.dtype)


def _vmem_capacity_bytes():
    try:
        cap = getattr(pltpu.get_tpu_info(), "vmem_capacity_bytes", None)
        if cap:
            return int(cap)
    except Exception:
        pass
    return 64 * 1024 * 1024   # conservative fallback: v7x per-TensorCore VMEM


def _pick_tile_n(O):
    # Lane-dense multiples of 128; prefer >= 2 grid steps on the "parallel" feature axis so
    # v7x can shard it over both TensorCores (harmless on single-TC parts).
    for cand in (512, 256, 128):
        if O % cand == 0 and O // cand >= 2:
            return cand
    for cand in (512, 256, 128):
        if O % cand == 0:
            return cand
    return O      # small / irregular feature dim: full-extent block is legal


def _choose_config(N, K, tile_n, compute_bytes):
    """Pick K handling (single step vs. reduction axis) and x residency from the VMEM budget."""
    f32 = 4
    budget = int(_vmem_capacity_bytes() * 0.75)        # headroom for compiler-internal scratch
    fixed = 2 * N * tile_n * f32 + 2 * 2 * tile_n * f32  # dbl-buffered output + packed gamma/beta

    # 1) Fast path: whole K axis in one block -> x DMA'd once, no reduction axis, no pl.when.
    single = fixed + 2 * N * K * compute_bytes + 2 * tile_n * K * compute_bytes
    if single <= budget:
        return {"mode": "single", "tile_k": K, "x_resident": True, "vmem": single}

    # 2) K reduction axis. Prefer keeping x fully VMEM-resident (read from HBM once).
    k_cands = [c for c in (512, 256, 128) if K % c == 0]
    for x_resident in (True, False):
        for tile_k in k_cands:
            x_bytes = (2 * N * K if x_resident else 2 * N * tile_k) * compute_bytes
            total = fixed + x_bytes + 2 * tile_n * tile_k * compute_bytes
            if total <= budget:
                return {"mode": "reduce", "tile_k": tile_k,
                        "x_resident": x_resident, "vmem": total}

    # 3) Nothing fits / K has no 128-multiple tiling: single full-K block as a last resort.
    # TODO(synk): add an N-tiled two-pass (sum / sum-of-squares) BN path for batches too large
    # for any of the above configurations.
    return {"mode": "single", "tile_k": K, "x_resident": True, "vmem": single}


def dense_block(x, weight, bias, gamma, beta, *, use_bf16_matmul=True, tile_n=None):
    """x: (N, K); weight: (O, K); bias/gamma/beta: (O,)  ->  (N, O) f32.

    Linear -> BatchNorm1d (batch statistics, biased variance, eps=1e-5) -> ReLU.
    """
    N, K = x.shape
    O, K2 = weight.shape
    assert K == K2
    del bias   # exactly cancelled by the batch-mean subtraction of training-mode BatchNorm

    compute_dtype = jnp.bfloat16 if use_bf16_matmul else x.dtype
    x_in = x.astype(compute_dtype)
    w_in = weight.astype(compute_dtype)                          # keep (O, K); contract last dims
    gb = jnp.stack([gamma, beta], axis=0).astype(jnp.float32)    # one packed per-feature stream

    if tile_n is None:
        tile_n = _pick_tile_n(O)
    assert O % tile_n == 0
    num_j = O // tile_n

    cfg = _choose_config(N, K, tile_n, jnp.dtype(compute_dtype).itemsize)
    vmem_limit = min(int(_vmem_capacity_bytes() * 0.85),
                     max(int(cfg["vmem"] * 1.5), 32 * 1024 * 1024))

    if cfg["mode"] == "single":
        kernel = _dense_block_single_kernel
        grid = (num_j,)
        in_specs = [
            pl.BlockSpec((N, K), lambda j: (0, 0)),            # x resident, read once
            pl.BlockSpec((tile_n, K), lambda j: (j, 0)),       # weight tile, original layout
            pl.BlockSpec((2, tile_n), lambda j: (0, j)),       # [gamma; beta]
        ]
        out_spec = pl.BlockSpec((N, tile_n), lambda j: (0, j))
        dim_sem = ("parallel",)
    else:
        tile_k = cfg["tile_k"]
        kernel = functools.partial(_dense_block_reduce_kernel,
                                   tile_k=tile_k, x_resident=cfg["x_resident"])
        grid = (num_j, K // tile_k)
        if cfg["x_resident"]:
            x_spec = pl.BlockSpec((N, K), lambda j, k: (0, 0))        # resident; sliced in-kernel
        else:
            x_spec = pl.BlockSpec((N, tile_k), lambda j, k: (0, k))   # streamed fallback
        in_specs = [
            x_spec,
            pl.BlockSpec((tile_n, tile_k), lambda j, k: (j, k)),
            pl.BlockSpec((2, tile_n), lambda j, k: (0, j)),
        ]
        out_spec = pl.BlockSpec((N, tile_n), lambda j, k: (0, j))     # resident across K
        dim_sem = ("parallel", "arbitrary")

    return pl.pallas_call(
        kernel,
        out_shape=jax.ShapeDtypeStruct((N, O), jnp.float32),
        grid_spec=pltpu.PrefetchScalarGridSpec(
            num_scalar_prefetch=0,
            grid=grid,
            in_specs=in_specs,
            out_specs=out_spec,
        ),
        compiler_params=pltpu.CompilerParams(
            dimension_semantics=dim_sem,
            vmem_limit_bytes=vmem_limit,
        ),
    )(x_in, w_in, gb)


def dense_block_ref(x, weight, bias, gamma, beta, *, matmul_dtype=jnp.float32):
    y = jnp.dot(x.astype(matmul_dtype), weight.astype(matmul_dtype).T,
                preferred_element_type=jnp.float32) + bias[None, :]
    mean = jnp.mean(y, axis=0, keepdims=True)
    var = jnp.mean((y - mean) ** 2, axis=0, keepdims=True)
    y_hat = (y - mean) * lax.rsqrt(var + EPS)
    out = y_hat * gamma[None, :] + beta[None, :]
    return jnp.maximum(out, 0.0)


if __name__ == "__main__":
    # Shapes consistent with DenseBlock(input_size=128, output_size=256), batch of 16.
    N, K, O = 16, 128, 256

    key = jax.random.PRNGKey(0)
    kx, kw, kb = jax.random.split(key, 3)

    x = jax.random.normal(kx, (N, K), dtype=jnp.float32)

    # PyTorch nn.Linear default-init-like parameters (deterministic).
    bound = 1.0 / np.sqrt(K)
    weight = jax.random.uniform(kw, (O, K), minval=-bound, maxval=bound, dtype=jnp.float32)
    bias = jax.random.uniform(kb, (O,), minval=-bound, maxval=bound, dtype=jnp.float32)
    # BatchNorm1d default init: gamma=1, beta=0.
    gamma = jnp.ones((O,), dtype=jnp.float32)
    beta = jnp.zeros((O,), dtype=jnp.float32)

    out = dense_block(x, weight, bias, gamma, beta)
    out = jax.block_until_ready(out)

    # Tight check vs. a reference mirroring the kernel's bf16 MXU operands (same math path).
    ref_bf16 = dense_block_ref(x, weight, bias, gamma, beta, matmul_dtype=jnp.bfloat16)
    np.testing.assert_allclose(np.asarray(out), np.asarray(ref_bf16), rtol=1e-3, atol=1e-3)

    # Loose check vs. the full-f32 PyTorch-equivalent reference: bf16 matmul noise after BN
    # normalization is a few 1e-3, well inside this tolerance.
    ref_f32 = dense_block_ref(x, weight, bias, gamma, beta)
    np.testing.assert_allclose(np.asarray(out), np.asarray(ref_f32), rtol=5e-2, atol=5e-2)

    print("KERNEL_OK")
</pallas_src>

<mosaic_0001>
module attributes {stable_mosaic.version = 11 : i64} {
  func.func @_dense_block_single_kernel(%arg0: i32, %arg1: memref<16x128xbf16, #tpu.memory_space<vmem>>, %arg2: memref<128x128xbf16, #tpu.memory_space<vmem>>, %arg3: memref<2x128xf32, #tpu.memory_space<vmem>>, %arg4: memref<16x128xf32, #tpu.memory_space<vmem>>) attributes {dimension_semantics = [#tpu.dimension_semantics<parallel>], iteration_bounds = array<i64: 2>, scalar_prefetch = 0 : i64, scratch_operands = 0 : i64, tpu.core_type = #tpu.core_type<tc>, window_params = [{pipeline_mode = #tpu.pipeline_mode<synchronous>, transform_indices = @transform_0, window_bounds = array<i64: 16, 128>}, {transform_indices = @transform_1, window_bounds = array<i64: 128, 128>}, {transform_indices = @transform_2, window_bounds = array<i64: 2, 128>}, {transform_indices = @transform_3, window_bounds = array<i64: 16, 128>}]} {
    %c0 = arith.constant 0 : index
    %c0_0 = arith.constant 0 : index
    %0 = vector.load %arg1[%c0, %c0_0] : memref<16x128xbf16, #tpu.memory_space<vmem>>, vector<16x128xbf16>
    %c0_1 = arith.constant 0 : index
    %c0_2 = arith.constant 0 : index
    %1 = vector.load %arg2[%c0_1, %c0_2] : memref<128x128xbf16, #tpu.memory_space<vmem>>, vector<128x128xbf16>
    %cst = arith.constant dense<0.000000e+00> : vector<16x128xf32>
    %2 = tpu.matmul %0, %1, %cst {dimension_numbers = #tpu.dot_dimension_numbers<[1], [1], [0], [0], [0, 0, 1, 0], [], []>} : vector<16x128xbf16>, vector<128x128xbf16>, vector<16x128xf32> -> vector<16x128xf32>
    %c0_3 = arith.constant 0 : index
    %c0_4 = arith.constant 0 : index
    %3 = vector.load %arg3[%c0_3, %c0_4] : memref<2x128xf32, #tpu.memory_space<vmem>>, vector<2x128xf32>
    %cst_5 = arith.constant dense<0.000000e+00> : vector<128xf32>
    %4 = vector.multi_reduction <add>, %2, %cst_5 [0] : vector<16x128xf32> to vector<128xf32>
    %5 = vector.shape_cast %4 : vector<128xf32> to vector<1x128xf32>
    %cst_6 = arith.constant 1.600000e+01 : f32
    %6 = vector.broadcast %cst_6 : f32 to vector<1x128xf32>
    %7 = arith.divf %5, %6 : vector<1x128xf32>
    %8 = vector.broadcast %7 : vector<1x128xf32> to vector<16x128xf32>
    %9 = arith.subf %2, %8 : vector<16x128xf32>
    %10 = arith.mulf %9, %9 : vector<16x128xf32>
    %cst_7 = arith.constant dense<0.000000e+00> : vector<128xf32>
    %11 = vector.multi_reduction <add>, %10, %cst_7 [0] : vector<16x128xf32> to vector<128xf32>
    %12 = vector.shape_cast %11 : vector<128xf32> to vector<1x128xf32>
    %cst_8 = arith.constant 1.600000e+01 : f32
    %13 = vector.broadcast %cst_8 : f32 to vector<1x128xf32>
    %14 = arith.divf %12, %13 : vector<1x128xf32>
    %cst_9 = arith.constant 9.99999974E-6 : f32
    %15 = vector.broadcast %cst_9 : f32 to vector<1x128xf32>
    %16 = arith.addf %14, %15 : vector<1x128xf32>
    %17 = math.rsqrt %16 : vector<1x128xf32>
    %18 = vector.broadcast %17 : vector<1x128xf32> to vector<16x128xf32>
    %19 = arith.mulf %9, %18 : vector<16x128xf32>
    %20 = vector.extract_strided_slice %3 {offsets = [0, 0], sizes = [1, 128], strides = [1, 1]} : vector<2x128xf32> to vector<1x128xf32>
    %21 = vector.broadcast %20 : vector<1x128xf32> to vector<16x128xf32>
    %22 = arith.mulf %19, %21 : vector<16x128xf32>
    %23 = vector.extract_strided_slice %3 {offsets = [1, 0], sizes = [1, 128], strides = [1, 1]} : vector<2x128xf32> to vector<1x128xf32>
    %24 = vector.broadcast %23 : vector<1x128xf32> to vector<16x128xf32>
    %25 = arith.addf %22, %24 : vector<16x128xf32>
    %cst_10 = arith.constant 0.000000e+00 : f32
    %26 = vector.broadcast %cst_10 : f32 to vector<16x128xf32>
    %27 = arith.maximumf %25, %26 : vector<16x128xf32>
    %c0_11 = arith.constant 0 : index
    %c0_12 = arith.constant 0 : index
    %28 = vector.load %arg4[%c0_11, %c0_12] : memref<16x128xf32, #tpu.memory_space<vmem>>, vector<16x128xf32>
    tpu.vector_store %arg4[%c0_11, %c0_12], %27 {strides = array<i32>} : memref<16x128xf32, #tpu.memory_space<vmem>>, vector<16x128xf32>,
    return
  }
  func.func @transform_0(%arg0: i32) -> (i32, i32) {
    %c0_i32 = arith.constant 0 : i32
    %c0_i32_0 = arith.constant 0 : i32
    %c0_i32_1 = arith.constant 0 : i32
    return %c0_i32, %c0_i32_0 : i32, i32
  }
  func.func @transform_1(%arg0: i32) -> (i32, i32) {
    %c0_i32 = arith.constant 0 : i32
    %c0_i32_0 = arith.constant 0 : i32
    return %arg0, %c0_i32 : i32, i32
  }
  func.func @transform_2(%arg0: i32) -> (i32, i32) {
    %c0_i32 = arith.constant 0 : i32
    %c0_i32_0 = arith.constant 0 : i32
    return %c0_i32, %arg0 : i32, i32
  }
  func.func @transform_3(%arg0: i32) -> (i32, i32) {
    %c0_i32 = arith.constant 0 : i32
    %c0_i32_0 = arith.constant 0 : i32
    return %c0_i32, %arg0 : i32, i32
  }
}

</mosaic_0001>

<bundles_post_ra>
// kernel: tpu_custom_call.1
= control target key start
LH: loop header
LB: loop body
LE: loop exit
PB: predicated region body
PF: predicated region fallthrough
CT: control target
= control target key end

     0   :  { %8 = vsyncpa [#allocation3], 0  ;;  %s1065_s0 = inlined_call_operand.hbm [shape: bf16[16,128], index: 0, kind: input, shape index: {}]   ;;  %s1066_s1 = inlined_call_operand.hbm [shape: bf16[256,128], index: 1, kind: input, shape index: {}]   ;;  %s1067_s2 = inlined_call_operand.hbm [shape: f32[2,256], index: 2, kind: input, shape index: {}]   ;;  %s1068_s3 = inlined_call_operand.hbm [shape: f32[16,256], index: 3, kind: output, shape index: {}]  }
   0x1   :  { %9 = vsyncpa [#allocation6], 0 }
   0x2   :  { %11 = vsyncpa [#allocation6 + $0x1], 0 }
   0x3   :  { %12 = vsyncpa [#allocation4], 0 }
   0x4   :  { %14 = vsyncpa [#allocation4 + $0x1], 0  ;;  %s833_s12 = smov 0   ;;  %s835_s13 = smov 0  }
   0x5   :  { %s837_s14 = smov 0   ;;  %s839_s15 = smov 0  }
   0x6 LB: > { %s854_s16 = sadd.s32 1, %s800_s15   ;;  %s48_s17 = sadd.s32 1, %s796_s14  ;;  %s800_s15 = sphi %s839_s15, %s1093_s15   ;;  %s796_s14 = sphi %s837_s14, %s1092_s14   ;;  %s792_s13 = sphi %s835_s13, %s1091_s13   ;;  %s788_s12 = sphi %s833_s12, %s1090_s12  }
   0x7   : > { %s45_s18 = ssub.s32 %s800_s15, %s854_s16  ;;  %p55_p0 = scmp.ne.s32.totalorder %s796_s14, %s792_s13 }
   0x8   : > { %p46_p1 = scmp.eq.s32.totalorder %s45_s18, 0  ;;  %p56_p2 = scmp.eq.s32.totalorder %s800_s15, 0 }
   0x9   : > { %p596_p5 = scmp.lt.s32.totalorder %s800_s15, 2  ;;  %s150_s20 = sand.u32 1, %s800_s15  }
   0xa   : > { %s863_s19 = scalar_select %p46_p1, %s796_s14, %s48_s17  }
   0xb   : > { %p57_p3 = por %p56_p2, %p55_p0  ;;  %s152_s21 = sand.u32 1, %s796_s14  }
   0xc   : > { %s517_s22 = sshll.u32 %s152_s21, 6  ;;  %s540_s23 = sshll.u32 %s800_s15, 10 }
   0xd   : > { %s878_s26 = scalar_lea.hbm %s1066_s1, %s540_s23  ;;  %s154_s27 = scalar_lea.vmem [#allocation5], %s517_s22 }
   0xe   : > { %s161_s28 = sshll.u32 %s154_s27, 4  ;;  %p880_p6 = pnand %p596_p5, %p57_p3  ;;  %s884_s28 = int_to_ptr.vmem [resolvable:$true] %s161_s28 }
   0xf   : > { %s886_s30 = scalar_lea.sflag [#allocation6], %s150_s20  ;;  %s650_s4 = scalar_lea.hbm %s878_s26, 1024 }
  0x10   : > { %p651_p7 = scmp.ne.s32.totalorder %s878_s26, %s650_s4  ;;  %p652_p8 = pneg %p880_p6 }
  0x11   : > { %s655_s7 = scalar_lea.hbm %s1066_s1, 2048  ;;  %p656_p11 = scmp.lt.s32.totalorder %s878_s26, %s1066_s1 }
  0x12   : > { %p653_p9 = pnand %p652_p8, %p651_p7  ;;  %p657_p12 = scmp.lt.s32.totalorder %s655_s7, %s650_s4 }
  0x14   : > { %p654_p10 = pneg %p653_p9  ;;  %p658_p13 = por %p657_p12, %p656_p11 }
  0x16   : > { %p659_p1 = pnand %p658_p13, %p654_p10 }
  0x18   : > { %662 = shalt.err (!%p659_p1)
}
  0x19   : > { %s663_s10 = scalar_lea.vmem %s884_s28, 1024  ;;  %s802_s11 = smov [#allocation5]  }
  0x1a   : > { %p664_p2 = scmp.ne.s32.totalorder %s884_s28, %s663_s10  ;;  %s668_s17 = sshll.u32 %s802_s11, 4  ;;  %s669_s17 = int_to_ptr.vmem [resolvable:$false] %s668_s17 }
  0x1b   : > { %s670_s18 = scalar_lea.vmem %s669_s17, 2048  ;;  %p671_p7 = scmp.lt.s32.totalorder %s884_s28, %s669_s17 }
  0x1c   : > { %p666_p3 = pnand %p664_p2, %p652_p8  ;;  %p672_p9 = scmp.lt.s32.totalorder %s670_s18, %s663_s10 }
  0x1e   : > { %p667_p5 = pneg %p666_p3  ;;  %p673_p4 = por %p672_p9, %p671_p7 }
  0x20   : > { %p674_p11 = pnand %p673_p4, %p667_p5 }
  0x22   : > { %677 = shalt.err (!%p674_p11)
}
  0x23   : > { %s1071_s20 = smov 64   ;;  %s804_s22 = smov 4  }
  0x24   : > { %587 = dma.hbm_to_vmem [thread:$0]  (!%p880_p6), %s878_s26, 1024, %s884_s28, %s886_s30, %s1071_s20, %s1071_s20, %s804_s22  }
  0x25   : > { %s917_s23 = sadd.s32 4294967295, %s800_s15   ;;  %s513_s24 = sadd.s32 4294967294, %s800_s15  }
  0x26   : > { %p61_p4 = scmp.ne.s32.totalorder %s792_s13, %s788_s12  ;;  %p1069_p10 = scmp.eq.s32.totalorder %s917_s23, 0 }
  0x27   : > { %p111_p12 = scmp.eq.s32.totalorder %s917_s23, 1  ;;  %p117_p13 = scmp.eq.s32.totalorder %s513_s24, 1 }
  0x28   : > { %p926_p1 = por %p1069_p10, %p61_p4  ;;  %p514_p2 = scmp.ge.s32.totalorder %s800_s15, 1 }
  0x29   : > { %p934_p3 = por %p111_p12, %p55_p0  ;;  %p938_p5 = por %p117_p13, %p61_p4 }
  0x2a   : > { %s1076_s25 = scalar_select %p926_p1, 1, 0 }
  0x2b   : > { %s1077_s26 = scalar_select %p934_p3, 1, 0 }
  0x2c   : > { %s1078_s27 = scalar_select %p938_p5, 1, 0 }
  0x2d   : > { %p124_p7 = scmp.lt.s32.totalorder %s800_s15, 3  ;;  %s520_s28 = sshll.u32 %s152_s21, 1 }
  0x2e   : > { %s805_s5 = smov [#allocation2]   ;;  %s521_s7 = sshll.u32 %s800_s15, 5 }
  0x2f   : > { %p945_p9 = pnand %p514_p2, %p124_p7  ;;  %s136_s6 = sshll.u32 %s805_s5, 4  ;;  %s949_s6 = int_to_ptr.vmem [resolvable:$true] %s136_s6 }
  0x30   : > { %s957_s10 = scalar_lea.hbm %s1067_s2, %s521_s7  ;;  %s175_s21 = scalar_lea.vmem [#allocation7], %s520_s28 }
  0x31   : > { %s1079_s4 = scalar_select %p945_p9, 1, 0 }
  0x32   : > { %p580_p0 = pneg %p945_p9  ;;  %s182_s11 = sshll.u32 %s175_s21, 4  ;;  %s183_s11 = int_to_ptr.vmem [resolvable:$true] %s182_s11 }
  0x33   : > { %s678_s18 = scalar_lea.hbm %s957_s10, 32  ;;  %s683_s7 = scalar_lea.hbm %s1067_s2, 64 }
  0x34   : > { %p961_p11 = pnand %p580_p0, %p1069_p10  ;;  %p679_p4 = scmp.ne.s32.totalorder %s957_s10, %s678_s18 }
  0x35   : > { %p684_p2 = scmp.lt.s32.totalorder %s957_s10, %s1067_s2  ;;  %p685_p7 = scmp.lt.s32.totalorder %s683_s7, %s678_s18 }
  0x36   : > { %s1080_s17 = scalar_select %p961_p11, 1, 0 }
  0x37   : > { %p681_p12 = pnand %p679_p4, %p652_p8  ;;  %p686_p0 = por %p685_p7, %p684_p2 }
  0x39   : > { %p682_p13 = pneg %p681_p12 }
  0x3b   : > { %p687_p10 = pnand %p686_p0, %p682_p13 }
  0x3d   : > { %690 = shalt.err (!%p687_p10)
}
  0x3e   : > { %s691_s28 = scalar_lea.vmem %s183_s11, 32  ;;  %s806_s21 = smov [#allocation7]  }
  0x3f   : > { %p692_p5 = scmp.ne.s32.totalorder %s183_s11, %s691_s28  ;;  %s696_s20 = sshll.u32 %s806_s21, 4  ;;  %s697_s20 = int_to_ptr.vmem [resolvable:$false] %s696_s20 }
  0x40   : > { %s698_s24 = scalar_lea.vmem %s697_s20, 64  ;;  %p699_p12 = scmp.lt.s32.totalorder %s183_s11, %s697_s20 }
  0x41   : > { %p694_p3 = pnand %p692_p5, %p652_p8  ;;  %p700_p1 = scmp.lt.s32.totalorder %s698_s24, %s691_s28 }
  0x43   : > { %p695_p4 = pneg %p694_p3  ;;  %p701_p9 = por %p700_p1, %p699_p12 }
  0x45   : > { %p702_p11 = pnand %p701_p9, %p695_p4 }
  0x47   : > { %705 = shalt.err (!%p702_p11)
}
  0x48   : > { %590 = dma.hbm_to_vmem [thread:$0]  (!%p880_p6), %s957_s10, 32, %s183_s11, %s886_s30  }
  0x49   : > { %p1081_p8 = scmp.ne.s32.totalorder %s1080_s17, 0  ;;  %s717_s18 = scalar_lea.vmem %s949_s6, 128 }
  0x4a   : > { %p718_p3 = scmp.ne.s32.totalorder %s949_s6, %s717_s18  ;;  %p725_p2 = scmp.lt.s32.totalorder %s949_s6, %s949_s6 }
  0x4b   : > { %p708_p10 = pneg %p1081_p8  ;;  %p726_p1 = scmp.lt.s32.totalorder %s717_s18, %s717_s18 }
  0x4d   : > { %p720_p5 = pnand %p718_p3, %p708_p10  ;;  %p727_p9 = por %p726_p1, %p725_p2 }
  0x4f   : > { %p721_p13 = pneg %p720_p5 }
  0x51   : > { %p728_p11 = pnand %p727_p9, %p721_p13 }
  0x53   : > { %731 = shalt.err (!%p728_p11)
}
  0x54   : > { %s1082_s29 = smov 64   ;;  %p1083_p6 = scmp.ne.s32.totalorder %s1079_s4, 0 }
  0x55   : > { %583 = dma.hbm_to_vmem [thread:$0]  (!%p1081_p8), %s1065_s0, 128, %s949_s6, [#allocation3], %s1082_s29, %s1082_s29, %s804_s22  }
  0x56   : > { %191 = sbr.rel (%p1083_p6) target bundleno = 434 (0x1b2), region = 32  ;;  %p1084_p7 = scmp.eq.s32.totalorder (!%p1083_p6), %s917_s23, 0 }
  0x5b   : > { %775 = dma.done.wait (%p1084_p7), [#allocation3], 128   ;;  %p1085_p0 = pmov %p1084_p7 }
  0x5c   : > { %s197_s10 = sand.u32 1, %s917_s23   ;;  %s1007_s11 = sand.u32 1, %s792_s13  }
  0x5d   : > { %777 = vsyncadd (%p1085_p0), [#allocation3], 4294967168  ;;  %s524_s17 = sshll.u32 %s1007_s11, 6  ;;  %s198_s5 = scalar_lea.sflag [#allocation6], %s197_s10 }
  0x5e   : > { %s201_s7 = scalar_lea.vmem [#allocation5], %s524_s17  ;;  %p1086_p4 = scmp.ne.s32.totalorder %s1076_s25, 0 }
  0x60   : > { %779 = dma.done.wait (%p1086_p4), %s198_s5, 1056  }
  0x61   : > { %781 = vsyncadd (%p1086_p4), %s198_s5, 4294966240  ;;  %v807_v0 = vmov 0.0   ;;  %vm808_vm0 = vmmov 0   ;;  %v639_v1 = vld [vmem:[%s201_s7 + $0x38] sm:$0xff]   ;;  %v640_v2 = vld [vmem:[%s201_s7 + $0x30] sm:$0xff]   ;;  %v379_v35 = vlaneseq  ;;  %s525_s22 = sshll.u32 %s1007_s11, 1 }
  0x62   : > { %550 = vmatprep.subr.bf16.mxu0 %v807_v0  ;;  %566 = vmatprep.mubr.msk.bf16.mxu0 %vm808_vm0, %v807_v0  ;;  %v641_v3 = vld [vmem:[%s201_s7 + $0x28] sm:$0xff]   ;;  %v642_v4 = vld [vmem:[%s201_s7 + $0x20] sm:$0xff]   ;;  %v643_v5 = vld [vmem:[%s201_s7 + $0x18] sm:$0xff]   ;;  %s526_s25 = sshll.u32 %s1007_s11, 4  ;;  %s210_s4 = scalar_lea.vmem [#allocation7], %s525_s22 }
  0x63   : > { %551 = vmatpush3.bf16.xpose.msra.mxu0 %v639_v1  ;;  %v644_v6 = vld [vmem:[%s201_s7 + $0x10] sm:$0xff]   ;;  %v645_v7 = vld [vmem:[%s201_s7 + $0x8] sm:$0xff]   ;;  %v646_v8 = vld [vmem:[%s201_s7] sm:$0xff]   ;;  %v380_v36 = vshrl.u32 %v379_v35, 7  ;;  %s237_s6 = scalar_lea.vmem [#allocation8], %s526_s25  ;;  %s537_s9 = sshll.u32 %s917_s23, 7 }
  0x64   : > { %552 = vmatprep.subr.bf16.mxu0 %v807_v0  ;;  %v647_v9 = vld [vmem:[#allocation2] sm:$0xff]   ;;  %v353_v38 = vld [vmem:[%s210_s4] sm:$0x3]  ;;  %s408_s8 = sshll.u32 %s237_s6, 4  ;;  %s1022_s24 = scalar_lea.hbm %s1068_s3, %s537_s9  ;;  %s1017_s8 = int_to_ptr.vmem [resolvable:$true] %s408_s8 }
  0x65   : > { %v381_v37 = vsub.s32 0, %v380_v36  ;;  %v387_v39 = vsub.s32 1, %v380_v36  ;;  %s396_s18 = scalar_lea.sflag [#allocation4], %s1007_s11  ;;  %s732_s29 = scalar_lea.vmem %s1017_s8, 256 }
  0x66   : > { %p733_p12 = scmp.ne.s32.totalorder %s1017_s8, %s732_s29  ;;  %p1087_p8 = scmp.ne.s32.totalorder %s1077_s26, 0 }
  0x67   : > { %v382_v40 = vrot.slane %v353_v38, %v381_v37  ;;  %v388_v44 = vrot.slane %v353_v38, %v387_v39  ;;  %s809_s23 = smov [#allocation8]  }
  0x68   : > { %p734_p10 = pnand %p733_p12, %p1087_p8  ;;  %s736_s20 = sshll.u32 %s809_s23, 4  ;;  %s737_s20 = int_to_ptr.vmem [resolvable:$false] %s736_s20 }
  0x69   : > { %s738_s30 = scalar_lea.vmem %s737_s20, 512  ;;  %p739_p5 = scmp.lt.s32.totalorder %s1017_s8, %s737_s20 }
  0x6a   : > { %p735_p3 = pneg %p734_p10  ;;  %p740_p13 = scmp.lt.s32.totalorder %s738_s30, %s732_s29 }
  0x6b   : > { %553 = vmatpush3.bf16.xpose.msra.mxu0 %v640_v2 }
  0x6c   : > { %554 = vmatprep.subr.bf16.mxu0 %v807_v0  ;;  %p741_p2 = por %p740_p13, %p739_p5 }
  0x6e   : > { %p742_p1 = pnand %p741_p2, %p735_p3 }
  0x73   : > { %555 = vmatpush3.bf16.xpose.msra.mxu0 %v641_v3 }
  0x74   : > { %556 = vmatprep.subr.bf16.mxu0 %v807_v0 }
  0x7b   : > { %557 = vmatpush3.bf16.xpose.msra.mxu0 %v642_v4 }
  0x7c   : > { %558 = vmatprep.subr.bf16.mxu0 %v807_v0 }
  0x83   : > { %559 = vmatpush3.bf16.xpose.msra.mxu0 %v643_v5 }
  0x84   : > { %560 = vmatprep.subr.bf16.mxu0 %v807_v0 }
  0x8b   : > { %561 = vmatpush3.bf16.xpose.msra.mxu0 %v644_v6 }
  0x8c   : > { %562 = vmatprep.subr.bf16.mxu0 %v807_v0 }
  0x93   : > { %563 = vmatpush3.bf16.xpose.msra.mxu0 %v645_v7 }
  0x94   : > { %564 = vmatprep.subr.bf16.mxu0 %v807_v0 }
  0x9b   : > { %565 = vmatpush3.bf16.xpose.msra.mxu0 %v646_v8 }
  0xa2   : > { %567 = vmatmul.mubr.bf16.vlgmr.msra.gmra.mxu0 %v647_v9 }
 0x162   : > { %v346_v10 = vpop.f32.mrf.mxu0 }
 0x164   : > { %v568_v11 = vpop.f32.mrf.mxu0 }
 0x166   : > { %v349_v12 = vpop.f32.mrf.mxu0 }
 0x167   : > { %v354_v13 = vadd.f32 %v349_v12, %v346_v10 }
 0x168   : > { %v569_v14 = vpop.f32.mrf.mxu0 }
 0x169   : > { %v355_v15 = vrot.slane %v354_v13, 4 }
 0x16b   : > { %v356_v16 = vadd.f32 %v355_v15, %v354_v13 }
 0x16d   : > { %v357_v17 = vrot.slane %v356_v16, 2 }
 0x16f   : > { %v358_v18 = vadd.f32 %v357_v17, %v356_v16 }
 0x171   : > { %v359_v19 = vrot.slane %v358_v18, 1 }
 0x173   : > { %v360_v20 = vadd.f32 %v359_v19, %v358_v18 }
 0x175   : > { %v362_v21 = vmul.f32 0.0625, %v360_v20 }
 0x177   : > { %v363_v22 = vsub.f32 %v346_v10, %v362_v21  ;;  %v364_v23 = vsub.f32 %v349_v12, %v362_v21 }
 0x179   : > { %v365_v24 = vmul.f32 %v363_v22, %v363_v22  ;;  %v366_v25 = vmul.f32 %v364_v23, %v364_v23 }
 0x17b   : > { %v367_v26 = vadd.f32 %v366_v25, %v365_v24 }
 0x17d   : > { %v368_v27 = vrot.slane %v367_v26, 4 }
 0x17f   : > { %v369_v28 = vadd.f32 %v368_v27, %v367_v26 }
 0x181   : > { %v370_v29 = vrot.slane %v369_v28, 2 }
 0x183   : > { %v371_v30 = vadd.f32 %v370_v29, %v369_v28 }
 0x185   : > { %v372_v31 = vrot.slane %v371_v30, 1 }
 0x187   : > { %v373_v32 = vadd.f32 %v372_v31, %v371_v30 }
 0x189   : > { %v374_v33 = vmul.f32 0.0625, %v373_v32 }
 0x18b   : > { %v375_v34 = vadd.f32 1e-05, %v374_v33 }
 0x18d   : > { %648 = vrsqrt.f32 %v375_v34 }
 0x19a   : > { %v649_v41 = vpop.eup %648 }
 0x19b   : > { %v377_v42 = vmul.f32 %v649_v41, %v363_v22  ;;  %v378_v43 = vmul.f32 %v649_v41, %v364_v23 }
 0x19d   : > { %v383_v45 = vmul.f32 %v382_v40, %v377_v42  ;;  %v384_v46 = vmul.f32 %v382_v40, %v378_v43 }
 0x19f   : > { %v389_v47 = vadd.f32 %v388_v44, %v383_v45  ;;  %v390_v48 = vadd.f32 %v388_v44, %v384_v46 }
 0x1a1   : > { %v391_v49 = vmax.f32 %v389_v47, 0.0  ;;  %v392_v50 = vmax.f32 %v390_v48, 0.0 }
 0x1a3   : > { %393 = vst [vmem:[%s237_s6] sm:$0xff] %v391_v49  ;;  %394 = vst [vmem:[%s237_s6 + $0x8] sm:$0xff] %v392_v50 }
 0x1a4   : > { %745 = shalt.err (!%p742_p1)
}
 0x1a5   : > { %s746_s10 = scalar_lea.hbm %s1022_s24, 256  ;;  %s750_s7 = scalar_lea.hbm %s1068_s3, 512 }
 0x1a6   : > { %p747_p9 = scmp.ne.s32.totalorder %s1022_s24, %s746_s10  ;;  %p751_p7 = scmp.lt.s32.totalorder %s1022_s24, %s1068_s3 }
 0x1a7   : > { %p752_p0 = scmp.lt.s32.totalorder %s750_s7, %s746_s10 }
 0x1a8   : > { %p748_p11 = pnand %p747_p9, %p1087_p8 }
 0x1a9   : > { %p753_p4 = por %p752_p0, %p751_p7 }
 0x1aa   : > { %p749_p6 = pneg %p748_p11 }
 0x1ac   : > { %p754_p12 = pnand %p753_p4, %p749_p6 }
 0x1ae   : > { %757 = shalt.err (!%p754_p12)
}
 0x1af   : > { %s810_s4 = smov 128   ;;  %s811_s6 = smov 256  }
 0x1b0   : > { %s812_s9 = smov 8  }
 0x1b1   : > { %578 = dma.vmem_to_hbm [thread:$0]  (%p1087_p8), %s1017_s8, 256, %s1022_s24, %s396_s18, %s810_s4, %s811_s6, %s812_s9  }
 0x1b2 PF: > { %s423_s28 = sand.u32 1, %s788_s12   ;;  %p1088_p10 = scmp.ne.s32.totalorder %s1078_s27, 0 }
 0x1b3   : > { %p1089_p3 = scmp.ge.s32.totalorder %s800_s15, 2  ;;  %s424_s21 = scalar_lea.sflag [#allocation4], %s423_s28 }
 0x1b5   : > { %p592_p5 = pnand %p1089_p3, %p1088_p10 }
 0x1b7   : > { %p593_p13 = pneg %p592_p5 }
 0x1b9   : > { %783 = dma.done.wait (%p593_p13), %s424_s21, 256  }
 0x1ba   : > { %785 = vsyncadd (%p593_p13), %s424_s21, 4294967040  ;;  %p17_p2 = scmp.ge.s32.totalorder %s854_s16, 4   ;;  %s1090_s12 = smov %s792_s13 }
 0x1bb   : > { %s1091_s13 = smov %s796_s14  ;;  %s1092_s14 = smov %s863_s19 }
 0x1bc   : > { %s1093_s15 = smov %s854_s16  ;;  %19 = sbr.rel (!%p17_p2) target bundleno = 6 (0x6), region = 93 }
 0x1c1   :  { %429 = vsyncpa [#allocation3], 1 }
 0x1c2   :  { %431 = vsyncpa [#allocation3 + $0x1], 1 }
 0x1c3   :  { %432 = vsyncpa [#allocation6], 1 }
 0x1c4   :  { %434 = vsyncpa [#allocation6 + $0x1], 1 }
 0x1c5   :  { %435 = vsyncpa [#allocation4], 1 }
 0x1c6   :  { %437 = vsyncpa [#allocation4 + $0x1], 1 }

</bundles_post_ra>
